<compile_context>
chip_gen: v6e
topology: v6e:2x2x1
jax: 0.10.0
libtpu: 0.0.40
codegen_flags: <defaults>
</compile_context>

<pallas_src>
import numpy as np
import jax
import jax.numpy as jnp
from jax.experimental import pallas as pl
from jax.experimental.pallas import tpu as pltpu

# ---- _PPO hyper-parameters (defaults of the PyTorch module) ----------------
EPSILON = 0.2
EPS = float(np.finfo(np.float32).eps)          # 1.1920929e-07
GAE_EXT_GAMMA = 0.999
GAE_EXT_LAMBDA = 0.95
GAE_INT_GAMMA = 0.99
GAE_INT_LAMBDA = 0.95
INT_WEIGHT = 1.0
EXT_WEIGHT = 1.0
EXT_COEFF = 0.5
INT_COEFF = 2.0
INT_FIT_COEFF = 1.0

# ---- problem sizes ---------------------------------------------------------
N_TRAJ = 2      # trajectories in the episode
T_STEPS = 8     # steps per trajectory
D_STATE = 32    # state feature dim
H_DIM = 32      # agent hidden dim
N_ACT = 8       # discrete action space size


# ---------------------------------------------------------------------------
# Host-side constant matrices: block-diagonal (over trajectories) discount /
# shift / segment-mean operators, folded so one (4*NT, 4*NT) matmul does the
# whole GAE pipeline.
# ---------------------------------------------------------------------------
def _discount_matrix(t, gamma):
    idx = np.arange(t)
    diff = idx[None, :] - idx[:, None]                      # s - t
    return np.where(diff >= 0,
                    np.power(float(gamma), np.maximum(diff, 0)),
                    0.0).astype(np.float32)


def _traj_block_diag(mat, n):
    return np.kron(np.eye(n, dtype=np.float32), mat).astype(np.float32)


def _build_gae_matrices(n, t):
    nt = n * t
    m_ext = _traj_block_diag(_discount_matrix(t, GAE_EXT_GAMMA), n)
    m_int = _traj_block_diag(_discount_matrix(t, GAE_INT_GAMMA), n)
    m_ext_gl = _traj_block_diag(
        _discount_matrix(t, GAE_EXT_GAMMA * GAE_EXT_LAMBDA), n)
    m_int_gl = _traj_block_diag(
        _discount_matrix(t, GAE_INT_GAMMA * GAE_INT_LAMBDA), n)
    shift = _traj_block_diag(np.eye(t, k=1, dtype=np.float32), n)
    eye = np.eye(nt, dtype=np.float32)
    # adv_ext = Mgl_e @ (r + g_e*S@v - v) = Mgl_e@r + A_e@v  (A_e precomputed)
    a_ext = m_ext_gl @ (GAE_EXT_GAMMA * shift - eye)
    a_int = m_int_gl @ (GAE_INT_GAMMA * shift - eye)
    seg = _traj_block_diag(np.full((t, t), 1.0 / t, dtype=np.float32), n)

    z = np.zeros((nt, nt), np.float32)
    # rhs layout: [reward ; intrinsic ; value_rollout ; intrinsic_rollout]
    row_vret = np.concatenate([m_ext, z, z, z], axis=1)
    row_iret = np.concatenate([z, m_int, z, z], axis=1)
    row_w = np.concatenate([EXT_WEIGHT * m_ext_gl, INT_WEIGHT * m_int_gl,
                            EXT_WEIGHT * a_ext, INT_WEIGHT * a_int], axis=1)
    row_wmean = seg @ row_w
    g = np.concatenate([row_vret, row_iret, row_w, row_wmean],
                       axis=0).astype(np.float32)           # (4*nt, 4*nt)
    return jnp.asarray(g), jnp.asarray(seg)


# ---------------------------------------------------------------------------
# Fused PPO forward: agent MLP + categorical log-prob + GAE + clipped
# surrogate loss, all in VMEM, one kernel invocation.
# ---------------------------------------------------------------------------
def ppo_forward(states, actions, rewards, intrinsic, intrinsic_loss, params):
    n, t, d = states.shape
    assert t > 1, "per-trajectory std (ddof=1) needs at least 2 steps"
    nt = n * t
    n_act = params["Wp"].shape[1]

    x = states.reshape(nt, d)
    a = actions.reshape(nt, 1).astype(jnp.int32)
    # sublane-stacked scalar pack: [reward ; intrinsic ; intrinsic_loss]
    scal = jnp.concatenate([rewards.reshape(nt, 1),
                            intrinsic.reshape(nt, 1),
                            intrinsic_loss.reshape(nt, 1)], axis=0)     # (3nt,1)
    # merged agent head: policy | value | intrinsic
    w_head = jnp.concatenate([params["Wp"], params["Wv"], params["Wi"]], axis=1)
    b_head = jnp.concatenate([params["bp"], params["bv"], params["bi"]], axis=1)
    g_mat, seg_mat = _build_gae_matrices(n, t)

    ddof_scale = float(t) / float(t - 1)      # unbiased std (torch.std default)
    inv_total = 1.0 / float(nt * n)           # mean over N*T, then / N_TRAJ

    def kernel(x_ref, a_ref, scal_ref, w1_ref, b1_ref, wh_ref, bh_ref,
               g_ref, seg_ref, loss_ref):
        # ---- agent MLP: one hidden matmul + one merged-head matmul ----
        h = jnp.maximum(
            jnp.dot(x_ref[...], w1_ref[...], preferred_element_type=jnp.float32)
            + b1_ref[...], 0.0)                                    # (NT, H)
        head = (jnp.dot(h, wh_ref[...], preferred_element_type=jnp.float32)
                + bh_ref[...])                                     # (NT, A+2)

        col = jax.lax.broadcasted_iota(jnp.int32, head.shape, 1)
        act_mask = col < n_act
        logits_m = jnp.where(act_mask, head, jnp.float32(-1e30))
        m = jnp.max(logits_m, axis=-1, keepdims=True)
        lse = m + jnp.log(jnp.sum(jnp.exp(logits_m - m), axis=-1, keepdims=True))
        onehot = (col == a_ref[...]).astype(jnp.float32)           # actions < A
        logp = jnp.sum((head - lse) * onehot, axis=-1, keepdims=True)   # (NT,1)
        value = jnp.sum(jnp.where(col == n_act, head, 0.0),
                        axis=-1, keepdims=True)                    # (NT,1)
        iro = jnp.sum(jnp.where(col == n_act + 1, head, 0.0),
                      axis=-1, keepdims=True)                      # (NT,1)
        # inner_loop == 0: fixed log-probs come from the same agent/params.
        fixed_logp = logp

        scal_all = scal_ref[...]                                   # (3NT,1)
        r = scal_all[0 * nt:1 * nt]
        irew = scal_all[1 * nt:2 * nt]
        il = scal_all[2 * nt:3 * nt]

        # ---- whole GAE / discount pipeline: one block-structured matmul ----
        rhs = jnp.concatenate([r, irew, value, iro], axis=0)       # (4NT,1)
        gae = jnp.dot(g_ref[...], rhs, preferred_element_type=jnp.float32)
        vret = gae[0 * nt:1 * nt]          # _discount(reward, g_ext)
        iret = gae[1 * nt:2 * nt]          # _discount(intrinsic, g_int)
        w_raw = gae[2 * nt:3 * nt]         # ext_w*adv_ext + int_w*adv_int
        w_mean = gae[3 * nt:4 * nt]        # per-trajectory mean of w_raw

        # per-trajectory normalization (unbiased std, + eps)
        wc = w_raw - w_mean
        var = jnp.dot(seg_ref[...], wc * wc,
                      preferred_element_type=jnp.float32) * ddof_scale
        w = wc / (jnp.sqrt(var) + EPS)

        # clipped PPO surrogates
        ratio = jnp.exp(logp - fixed_logp)
        s1 = ratio * w
        s2 = jnp.clip(ratio, 1.0 - EPSILON, 1.0 + EPSILON) * w

        # lane-pack the four per-element loss terms and reduce once
        terms = jnp.concatenate(
            [-jnp.minimum(s1, s2),
             EXT_COEFF * (value - vret) ** 2,
             INT_COEFF * (iro - iret) ** 2,
             INT_FIT_COEFF * il], axis=1)                          # (NT, 4)
        loss = jnp.sum(jnp.sum(terms, axis=1, keepdims=True),
                       axis=0, keepdims=True) * inv_total          # (1, 1)
        loss_ref[...] = loss

    vmem = pltpu.MemorySpace.VMEM
    loss = pl.pallas_call(
        kernel,
        out_shape=jax.ShapeDtypeStruct((1, 1), jnp.float32),
        in_specs=[pl.BlockSpec(memory_space=vmem)] * 9,
        out_specs=pl.BlockSpec(memory_space=vmem),
    )(x, a, scal, params["W1"], params["b1"], w_head, b_head, g_mat, seg_mat)
    return loss[0, 0]


# ---------------------------------------------------------------------------
# Pure-JAX reference (mirrors the PyTorch forward) for validation.
# ---------------------------------------------------------------------------
def _discount_ref(x, gamma):
    out = []
    running = jnp.float32(0.0)
    for i in range(x.shape[0] - 1, -1, -1):
        running = x[i] + gamma * running
        out.append(running)
    return jnp.stack(out[::-1])


def ppo_reference(states, actions, rewards, intrinsic, intrinsic_loss, params):
    n = states.shape[0]
    hp = "highest"
    seqs = [[] for _ in range(7)]
    for k in range(n):
        x = states[k]
        h = jnp.maximum(jnp.dot(x, params["W1"], precision=hp) + params["b1"], 0.0)
        logits = jnp.dot(h, params["Wp"], precision=hp) + params["bp"]
        value = (jnp.dot(h, params["Wv"], precision=hp) + params["bv"])[:, 0]
        iro = (jnp.dot(h, params["Wi"], precision=hp) + params["bi"])[:, 0]
        lse = jax.scipy.special.logsumexp(logits, axis=-1)
        act = actions[k, :, 0]
        logp = jnp.take_along_axis(logits, act[:, None], axis=-1)[:, 0] - lse
        fixed_logp = logp                       # inner_loop == 0
        r = rewards[k, :, 0]
        irew = intrinsic[k, :, 0]
        il = intrinsic_loss[k, :, 0]
        vret = _discount_ref(r, GAE_EXT_GAMMA)
        iret = _discount_ref(irew, GAE_INT_GAMMA)
        v_next = jnp.concatenate([value[1:], jnp.zeros((1,), jnp.float32)])
        iro_next = jnp.concatenate([iro[1:], jnp.zeros((1,), jnp.float32)])
        adv_e = _discount_ref(r + GAE_EXT_GAMMA * v_next - value,
                              GAE_EXT_GAMMA * GAE_EXT_LAMBDA)
        adv_i = _discount_ref(irew + GAE_INT_GAMMA * iro_next - iro,
                              GAE_INT_GAMMA * GAE_INT_LAMBDA)
        w = EXT_WEIGHT * adv_e + INT_WEIGHT * adv_i
        w = (w - w.mean()) / (jnp.std(w, ddof=1) + EPS)
        ratio = jnp.exp(logp - fixed_logp)
        s1 = ratio * w
        s2 = jnp.clip(ratio, 1.0 - EPSILON, 1.0 + EPSILON) * w
        for i, t_ in enumerate((s1, s2, value, vret, iro, iret, il)):
            seqs[i].append(t_)
    seqs = [jnp.concatenate(s) for s in seqs]
    loss = (-jnp.minimum(seqs[0], seqs[1]).mean()
            + jnp.mean((seqs[2] - seqs[3]) ** 2) * EXT_COEFF
            + jnp.mean((seqs[4] - seqs[5]) ** 2) * INT_COEFF
            + seqs[6].mean() * INT_FIT_COEFF)
    return loss / n


if __name__ == "__main__":
    key = jax.random.PRNGKey(0)
    keys = jax.random.split(key, 9)

    # synthetic episode: N_TRAJ equal-length trajectories of T_STEPS steps
    states = jax.random.normal(keys[0], (N_TRAJ, T_STEPS, D_STATE), jnp.float32)
    actions = jax.random.randint(keys[1], (N_TRAJ, T_STEPS, 1), 0, N_ACT,
                                 dtype=jnp.int32)
    rewards = jax.random.normal(keys[2], (N_TRAJ, T_STEPS, 1), jnp.float32)
    intrinsic = 0.5 * jax.random.uniform(keys[3], (N_TRAJ, T_STEPS, 1),
                                         jnp.float32)
    intrinsic_loss = 0.1 * jax.random.uniform(keys[4], (N_TRAJ, T_STEPS, 1),
                                              jnp.float32)

    # deterministic synthetic agent parameters
    params = {
        "W1": 0.1 * jax.random.normal(keys[5], (D_STATE, H_DIM), jnp.float32),
        "b1": jnp.zeros((1, H_DIM), jnp.float32),
        "Wp": 0.1 * jax.random.normal(keys[6], (H_DIM, N_ACT), jnp.float32),
        "bp": jnp.zeros((1, N_ACT), jnp.float32),
        "Wv": 0.1 * jax.random.normal(keys[7], (H_DIM, 1), jnp.float32),
        "bv": jnp.zeros((1, 1), jnp.float32),
        "Wi": 0.1 * jax.random.normal(keys[8], (H_DIM, 1), jnp.float32),
        "bi": jnp.zeros((1, 1), jnp.float32),
    }

    # fused agent forward + PPO loss (single Pallas kernel)
    loss = ppo_forward(states, actions, rewards, intrinsic, intrinsic_loss,
                       params)
    loss = jax.block_until_ready(loss)

    ref = ppo_reference(states, actions, rewards, intrinsic, intrinsic_loss,
                        params)
    np.testing.assert_allclose(np.asarray(loss), np.asarray(ref),
                               rtol=5e-3, atol=5e-3)
    print("KERNEL_OK")
</pallas_src>

<mosaic_0001>
module attributes {stable_mosaic.version = 11 : i64} {
  func.func @kernel(%arg0: memref<16x32xf32, #tpu.memory_space<vmem>>, %arg1: memref<16x1xi32, #tpu.memory_space<vmem>>, %arg2: memref<48x1xf32, #tpu.memory_space<vmem>>, %arg3: memref<32x32xf32, #tpu.memory_space<vmem>>, %arg4: memref<1x32xf32, #tpu.memory_space<vmem>>, %arg5: memref<32x10xf32, #tpu.memory_space<vmem>>, %arg6: memref<1x10xf32, #tpu.memory_space<vmem>>, %arg7: memref<64x64xf32, #tpu.memory_space<vmem>>, %arg8: memref<16x16xf32, #tpu.memory_space<vmem>>, %arg9: memref<1x1xf32, #tpu.memory_space<vmem>>) attributes {dimension_semantics = [], scalar_prefetch = 0 : i64, scratch_operands = 0 : i64, tpu.core_type = #tpu.core_type<tc>} {
    %c0 = arith.constant 0 : index
    %c0_0 = arith.constant 0 : index
    %0 = vector.load %arg0[%c0, %c0_0] : memref<16x32xf32, #tpu.memory_space<vmem>>, vector<16x32xf32>
    %c0_1 = arith.constant 0 : index
    %c0_2 = arith.constant 0 : index
    %1 = vector.load %arg3[%c0_1, %c0_2] : memref<32x32xf32, #tpu.memory_space<vmem>>, vector<32x32xf32>
    %cst = arith.constant dense<0.000000e+00> : vector<16x32xf32>
    %2 = tpu.matmul %0, %1, %cst {dimension_numbers = #tpu.dot_dimension_numbers<[1], [0], [0], [1], [0, 0, 1, 1], [], []>} : vector<16x32xf32>, vector<32x32xf32>, vector<16x32xf32> -> vector<16x32xf32>
    %c0_3 = arith.constant 0 : index
    %c0_4 = arith.constant 0 : index
    %3 = vector.load %arg4[%c0_3, %c0_4] : memref<1x32xf32, #tpu.memory_space<vmem>>, vector<1x32xf32>
    %4 = vector.broadcast %3 : vector<1x32xf32> to vector<16x32xf32>
    %5 = arith.addf %2, %4 : vector<16x32xf32>
    %cst_5 = arith.constant 0.000000e+00 : f32
    %6 = vector.broadcast %cst_5 : f32 to vector<16x32xf32>
    %7 = arith.maximumf %5, %6 : vector<16x32xf32>
    %c0_6 = arith.constant 0 : index
    %c0_7 = arith.constant 0 : index
    %8 = vector.load %arg5[%c0_6, %c0_7] : memref<32x10xf32, #tpu.memory_space<vmem>>, vector<32x10xf32>
    %cst_8 = arith.constant dense<0.000000e+00> : vector<16x10xf32>
    %9 = tpu.matmul %7, %8, %cst_8 {dimension_numbers = #tpu.dot_dimension_numbers<[1], [0], [0], [1], [0, 0, 1, 1], [], []>} : vector<16x32xf32>, vector<32x10xf32>, vector<16x10xf32> -> vector<16x10xf32>
    %c0_9 = arith.constant 0 : index
    %c0_10 = arith.constant 0 : index
    %10 = vector.load %arg6[%c0_9, %c0_10] : memref<1x10xf32, #tpu.memory_space<vmem>>, vector<1x10xf32>
    %11 = vector.broadcast %10 : vector<1x10xf32> to vector<16x10xf32>
    %12 = arith.addf %9, %11 : vector<16x10xf32>
    %13 = tpu.iota {dimensions = array<i32: 1>} : vector<16x10xi32>
    %c8_i32 = arith.constant 8 : i32
    %14 = vector.broadcast %c8_i32 : i32 to vector<16x10xi32>
    %15 = arith.cmpi slt, %13, %14 : vector<16x10xi32>
    %cst_11 = arith.constant -1.000000e+30 : f32
    %16 = vector.broadcast %cst_11 : f32 to vector<16x10xf32>
    %17 = arith.select %15, %12, %16 : vector<16x10xi1>, vector<16x10xf32>
    %cst_12 = arith.constant dense<0xFF800000> : vector<16xf32>
    %18 = vector.multi_reduction <maximumf>, %17, %cst_12 [1] : vector<16x10xf32> to vector<16xf32>
    %19 = vector.shape_cast %18 : vector<16xf32> to vector<16x1xf32>
    %20 = vector.broadcast %19 : vector<16x1xf32> to vector<16x10xf32>
    %21 = arith.subf %17, %20 : vector<16x10xf32>
    %22 = math.exp %21 : vector<16x10xf32>
    %cst_13 = arith.constant dense<0.000000e+00> : vector<16xf32>
    %23 = vector.multi_reduction <add>, %22, %cst_13 [1] : vector<16x10xf32> to vector<16xf32>
    %24 = vector.shape_cast %23 : vector<16xf32> to vector<16x1xf32>
    %25 = math.log %24 : vector<16x1xf32>
    %26 = arith.addf %19, %25 : vector<16x1xf32>
    %c0_14 = arith.constant 0 : index
    %c0_15 = arith.constant 0 : index
    %27 = vector.load %arg1[%c0_14, %c0_15] : memref<16x1xi32, #tpu.memory_space<vmem>>, vector<16x1xi32>
    %28 = vector.broadcast %27 : vector<16x1xi32> to vector<16x10xi32>
    %29 = arith.cmpi eq, %13, %28 : vector<16x10xi32>
    %30 = arith.extui %29 : vector<16x10xi1> to vector<16x10xi32>
    %31 = arith.sitofp %30 : vector<16x10xi32> to vector<16x10xf32>
    %32 = vector.broadcast %26 : vector<16x1xf32> to vector<16x10xf32>
    %33 = arith.subf %12, %32 : vector<16x10xf32>
    %34 = arith.mulf %33, %31 : vector<16x10xf32>
    %cst_16 = arith.constant dense<0.000000e+00> : vector<16xf32>
    %35 = vector.multi_reduction <add>, %34, %cst_16 [1] : vector<16x10xf32> to vector<16xf32>
    %36 = vector.shape_cast %35 : vector<16xf32> to vector<16x1xf32>
    %c8_i32_17 = arith.constant 8 : i32
    %37 = vector.broadcast %c8_i32_17 : i32 to vector<16x10xi32>
    %38 = arith.cmpi eq, %13, %37 : vector<16x10xi32>
    %cst_18 = arith.constant 0.000000e+00 : f32
    %39 = vector.broadcast %cst_18 : f32 to vector<16x10xf32>
    %40 = arith.select %38, %12, %39 : vector<16x10xi1>, vector<16x10xf32>
    %cst_19 = arith.constant dense<0.000000e+00> : vector<16xf32>
    %41 = vector.multi_reduction <add>, %40, %cst_19 [1] : vector<16x10xf32> to vector<16xf32>
    %42 = vector.shape_cast %41 : vector<16xf32> to vector<16x1xf32>
    %c9_i32 = arith.constant 9 : i32
    %43 = vector.broadcast %c9_i32 : i32 to vector<16x10xi32>
    %44 = arith.cmpi eq, %13, %43 : vector<16x10xi32>
    %cst_20 = arith.constant 0.000000e+00 : f32
    %45 = vector.broadcast %cst_20 : f32 to vector<16x10xf32>
    %46 = arith.select %44, %12, %45 : vector<16x10xi1>, vector<16x10xf32>
    %cst_21 = arith.constant dense<0.000000e+00> : vector<16xf32>
    %47 = vector.multi_reduction <add>, %46, %cst_21 [1] : vector<16x10xf32> to vector<16xf32>
    %48 = vector.shape_cast %47 : vector<16xf32> to vector<16x1xf32>
    %c0_22 = arith.constant 0 : index
    %c0_23 = arith.constant 0 : index
    %49 = vector.load %arg2[%c0_22, %c0_23] : memref<48x1xf32, #tpu.memory_space<vmem>>, vector<48x1xf32>
    %50 = vector.extract_strided_slice %49 {offsets = [0, 0], sizes = [16, 1], strides = [1, 1]} : vector<48x1xf32> to vector<16x1xf32>
    %51 = vector.extract_strided_slice %49 {offsets = [16, 0], sizes = [16, 1], strides = [1, 1]} : vector<48x1xf32> to vector<16x1xf32>
    %52 = vector.extract_strided_slice %49 {offsets = [32, 0], sizes = [16, 1], strides = [1, 1]} : vector<48x1xf32> to vector<16x1xf32>
    %53 = tpu.concatenate %50, %51, %42, %48 in 0 : vector<16x1xf32>, vector<16x1xf32>, vector<16x1xf32>, vector<16x1xf32> -> vector<64x1xf32>
    %c0_24 = arith.constant 0 : index
    %c0_25 = arith.constant 0 : index
    %54 = vector.load %arg7[%c0_24, %c0_25] : memref<64x64xf32, #tpu.memory_space<vmem>>, vector<64x64xf32>
    %cst_26 = arith.constant dense<0.000000e+00> : vector<64x1xf32>
    %55 = tpu.matmul %54, %53, %cst_26 {dimension_numbers = #tpu.dot_dimension_numbers<[1], [0], [0], [1], [0, 0, 1, 1], [], []>} : vector<64x64xf32>, vector<64x1xf32>, vector<64x1xf32> -> vector<64x1xf32>
    %56 = vector.extract_strided_slice %55 {offsets = [0, 0], sizes = [16, 1], strides = [1, 1]} : vector<64x1xf32> to vector<16x1xf32>
    %57 = vector.extract_strided_slice %55 {offsets = [16, 0], sizes = [16, 1], strides = [1, 1]} : vector<64x1xf32> to vector<16x1xf32>
    %58 = vector.extract_strided_slice %55 {offsets = [32, 0], sizes = [16, 1], strides = [1, 1]} : vector<64x1xf32> to vector<16x1xf32>
    %59 = vector.extract_strided_slice %55 {offsets = [48, 0], sizes = [16, 1], strides = [1, 1]} : vector<64x1xf32> to vector<16x1xf32>
    %60 = arith.subf %58, %59 : vector<16x1xf32>
    %c0_27 = arith.constant 0 : index
    %c0_28 = arith.constant 0 : index
    %61 = vector.load %arg8[%c0_27, %c0_28] : memref<16x16xf32, #tpu.memory_space<vmem>>, vector<16x16xf32>
    %62 = arith.mulf %60, %60 : vector<16x1xf32>
    %cst_29 = arith.constant dense<0.000000e+00> : vector<16x1xf32>
    %63 = tpu.matmul %61, %62, %cst_29 {dimension_numbers = #tpu.dot_dimension_numbers<[1], [0], [0], [1], [0, 0, 1, 1], [], []>} : vector<16x16xf32>, vector<16x1xf32>, vector<16x1xf32> -> vector<16x1xf32>
    %cst_30 = arith.constant 1.14285719 : f32
    %64 = vector.broadcast %cst_30 : f32 to vector<16x1xf32>
    %65 = arith.mulf %63, %64 : vector<16x1xf32>
    %66 = math.sqrt %65 : vector<16x1xf32>
    %cst_31 = arith.constant 1.1920929E-7 : f32
    %67 = vector.broadcast %cst_31 : f32 to vector<16x1xf32>
    %68 = arith.addf %66, %67 : vector<16x1xf32>
    %69 = arith.divf %60, %68 : vector<16x1xf32>
    %70 = arith.subf %36, %36 : vector<16x1xf32>
    %71 = math.exp %70 : vector<16x1xf32>
    %72 = arith.mulf %71, %69 : vector<16x1xf32>
    %cst_32 = arith.constant 8.000000e-01 : f32
    %cst_33 = arith.constant 1.200000e+00 : f32
    %73 = vector.broadcast %cst_32 : f32 to vector<16x1xf32>
    %74 = arith.maximumf %73, %71 : vector<16x1xf32>
    %75 = vector.broadcast %cst_33 : f32 to vector<16x1xf32>
    %76 = arith.minimumf %75, %74 : vector<16x1xf32>
    %77 = arith.mulf %76, %69 : vector<16x1xf32>
    %78 = arith.minimumf %72, %77 : vector<16x1xf32>
    %cst_34 = arith.constant 0.000000e+00 : f32
    %79 = vector.broadcast %cst_34 : f32 to vector<16x1xf32>
    %80 = arith.subf %79, %78 : vector<16x1xf32>
    %81 = arith.subf %42, %56 : vector<16x1xf32>
    %82 = arith.mulf %81, %81 : vector<16x1xf32>
    %cst_35 = arith.constant 5.000000e-01 : f32
    %83 = vector.broadcast %cst_35 : f32 to vector<16x1xf32>
    %84 = arith.mulf %83, %82 : vector<16x1xf32>
    %85 = arith.subf %48, %57 : vector<16x1xf32>
    %86 = arith.mulf %85, %85 : vector<16x1xf32>
    %cst_36 = arith.constant 2.000000e+00 : f32
    %87 = vector.broadcast %cst_36 : f32 to vector<16x1xf32>
    %88 = arith.mulf %87, %86 : vector<16x1xf32>
    %cst_37 = arith.constant 1.000000e+00 : f32
    %89 = vector.broadcast %cst_37 : f32 to vector<16x1xf32>
    %90 = arith.mulf %89, %52 : vector<16x1xf32>
    %91 = tpu.concatenate %80, %84, %88, %90 in 1 : vector<16x1xf32>, vector<16x1xf32>, vector<16x1xf32>, vector<16x1xf32> -> vector<16x4xf32>
    %cst_38 = arith.constant dense<0.000000e+00> : vector<16xf32>
    %92 = vector.multi_reduction <add>, %91, %cst_38 [1] : vector<16x4xf32> to vector<16xf32>
    %93 = vector.shape_cast %92 : vector<16xf32> to vector<16x1xf32>
    %cst_39 = arith.constant dense<0.000000e+00> : vector<1xf32>
    %94 = vector.multi_reduction <add>, %93, %cst_39 [0] : vector<16x1xf32> to vector<1xf32>
    %95 = vector.shape_cast %94 : vector<1xf32> to vector<1x1xf32>
    %cst_40 = arith.constant 3.125000e-02 : f32
    %96 = vector.broadcast %cst_40 : f32 to vector<1x1xf32>
    %97 = arith.mulf %95, %96 : vector<1x1xf32>
    %c0_41 = arith.constant 0 : index
    %c0_42 = arith.constant 0 : index
    %98 = vector.load %arg9[%c0_41, %c0_42] : memref<1x1xf32, #tpu.memory_space<vmem>>, vector<1x1xf32>
    tpu.vector_store %arg9[%c0_41, %c0_42], %97 {strides = array<i32>} : memref<1x1xf32, #tpu.memory_space<vmem>>, vector<1x1xf32>,
    return
  }
}

</mosaic_0001>

<bundles_post_ra>
// kernel: tpu_custom_call.1
= control target key start
LH: loop header
LB: loop body
LE: loop exit
PB: predicated region body
PF: predicated region fallthrough
CT: control target
= control target key end

     0   :  { %14 = vsyncpa [#allocation3], 0  ;;  %s1085_s0 = inlined_call_operand.vmem [shape: f32[16,32], index: 0, kind: input, shape index: {}]   ;;  %s1086_s1 = inlined_call_operand.vmem [shape: s32[16,1], index: 1, kind: input, shape index: {}]   ;;  %s1087_s2 = inlined_call_operand.vmem [shape: f32[48,1], index: 2, kind: input, shape index: {}]   ;;  %s1088_s3 = inlined_call_operand.vmem [shape: f32[32,32], index: 3, kind: input, shape index: {}]   ;;  %s1089_s4 = inlined_call_operand.hbm [shape: f32[1,32], index: 4, kind: input, shape index: {}]   ;;  %s1090_s5 = inlined_call_operand.vmem [shape: f32[32,10], index: 5, kind: input, shape index: {}]   ;;  %s1091_s6 = inlined_call_operand.hbm [shape: f32[1,10], index: 6, kind: input, shape index: {}]   ;;  %s1092_s7 = inlined_call_operand.vmem [shape: f32[64,64], index: 7, kind: input, shape index: {}]   ;;  %s1093_s8 = inlined_call_operand.vmem [shape: f32[16,16], index: 8, kind: input, shape index: {}]   ;;  %s1094_s9 = inlined_call_operand.hbm [shape: f32[1,1], index: 9, kind: output, shape index: {}]  }
   0x1   :  { %15 = vsyncpa [#allocation6], 0 }
   0x2   :  { %16 = vsyncpa [#allocation4], 0  ;;  %s871_s30 = smov [#allocation2]   ;;  %s872_s11 = smov [#allocation5]  }
   0x3   :  { %s31_s10 = sshll.u32 %s871_s30, 4  ;;  %s43_s12 = sshll.u32 %s872_s11, 4  ;;  %s32_s10 = int_to_ptr.vmem [resolvable:$true] %s31_s10  ;;  %s44_s12 = int_to_ptr.vmem [resolvable:$true] %s43_s12 }
   0x4   :  { %s813_s13 = scalar_lea.vmem %s32_s10, 16  ;;  %s817_s14 = scalar_lea.vmem %s32_s10, 32 }
   0x5   :  { %p814_p0 = scmp.ne.s32.totalorder %s32_s10, %s813_s13  ;;  %p818_p1 = scmp.lt.s32.totalorder %s32_s10, %s32_s10 }
   0x6   :  { %p819_p2 = scmp.lt.s32.totalorder %s817_s14, %s813_s13 }
   0x8   :  { %p820_p3 = por %p819_p2, %p818_p1 }
   0xa   :  { %p821_p4 = pnand %p820_p3, %p814_p0 }
   0xc   :  { %824 = shalt.err (!%p821_p4)
}
   0xd   :  { %34 = dma.hbm_to_vmem [thread:$0]  %s1089_s4, 16, %s32_s10, [#allocation3]  }
   0xe   :  { %s833_s17 = scalar_lea.vmem %s44_s12, 16  ;;  %s837_s18 = scalar_lea.vmem %s44_s12, 32 }
   0xf   :  { %p834_p5 = scmp.ne.s32.totalorder %s44_s12, %s833_s17  ;;  %p838_p6 = scmp.lt.s32.totalorder %s44_s12, %s44_s12 }
  0x10   :  { %p839_p7 = scmp.lt.s32.totalorder %s837_s18, %s833_s17 }
  0x12   :  { %p840_p8 = por %p839_p7, %p838_p6 }
  0x14   :  { %p841_p9 = pnand %p840_p8, %p834_p5 }
  0x16   :  { %844 = shalt.err (!%p841_p9)
}
  0x17   :  { %46 = dma.hbm_to_vmem [thread:$0]  %s1091_s6, 16, %s44_s12, [#allocation6]  }
  0x18   :  { %865 = dma.done.wait [#allocation3], 16  }
  0x19   :  { %866 = vsyncadd [#allocation3], 4294967280 }
  0x1a   :  { %867 = dma.done.wait [#allocation6], 16  }
  0x1b   :  { %868 = vsyncadd [#allocation6], 4294967280  ;;  %vm70_vm0 = vcmask 261120   ;;  %v62_v0 = vld [vmem:[%s1088_s3 + $0x18] sm:$0xff]  ;;  %v61_v1 = vld [vmem:[%s1088_s3 + $0x10] sm:$0xff]  ;;  %v246_v17 = vlaneseq  ;;  %vm251_vm3 = vcmask 80896  }
  0x1c   :  { %718 = vmatprep.subr.mxu1 %v62_v0  ;;  %v57_v2 = vld [vmem:[%s1085_s0] sm:$0xff]  ;;  %v60_v3 = vld [vmem:[%s1088_s3 + $0x8] sm:$0xff]  ;;  %v157_v6 = vld [vmem:[%s1090_s5 + $0x18] sm:$0xff]  ;;  %vm332_vm5 = vcmask 523264   ;;  %v873_v37 = vmov 0   ;;  %vm468_vm6 = vcmask 130048  }
  0x1d   :  { %719 = vmatpush3.msra.mxu1 %v62_v0  ;;  %726 = vmatprep.mubr.msk.f32.mxu1 %vm70_vm0, %v57_v2  ;;  %v59_v4 = vld [vmem:[%s1088_s3] sm:$0xff]  ;;  %v58_v5 = vld [vmem:[%s1085_s0 + $0x8] sm:$0xff]  ;;  %v156_v7 = vld [vmem:[%s1090_s5 + $0x10] sm:$0xff]  ;;  %v969_v18 = vand.u32 127, %v246_v17  ;;  %s877_s21 = smov 3   ;;  %vm626_vm13 = vcmask 7168  }
  0x1e   :  { %720 = vmatprep.subr.mxu1 %v61_v1  ;;  %v155_v8 = vld [vmem:[%s1090_s5 + $0x8] sm:$0xff]  ;;  %v154_v9 = vld [vmem:[%s1090_s5] sm:$0xff]  ;;  %784 = vset.pattern.permute.xlu1 %v873_v37  ;;  %v321_v44 = vld [vmem:[%s1087_s2 + $0x18] sm:$0xff]  ;;  %vm629_vm14 = vcmask 15360   ;;  %vm632_vm15 = vcmask 23552  }
  0x1f   :  { %721 = vmatpush3.msra.mxu1 %v61_v1  ;;  %v668_v10 = vld [vmem:[#allocation2] ss:$0 sm:$0xff]  ;;  %v671_v19 = vld [vmem:[#allocation5] ss:$0 sm:$0xff]  ;;  %vm309_vm1 = vcmp.eq.s32.totalorder %v969_v18, 9  ;;  %vm300_vm2 = vcmp.eq.s32.totalorder %v969_v18, 8  ;;  %783 = vset.pattern.permute.xlu0 %v873_v37 }
  0x20   :  { %722 = vmatprep.subr.mxu1 %v60_v3  ;;  %vm248_vm4 = vcmp.lt.s32.totalorder %v969_v18, 8  ;;  %v324_v36 = vld [vmem:[%s1092_s7] sm:$0xff]  ;;  %v320_v47 = vld [vmem:[%s1087_s2 + $0x10] sm:$0xff]  ;;  %v319_v50 = vld [vmem:[%s1087_s2 + $0x8] sm:$0xff] }
  0x21   :  { %723 = vmatpush3.msra.mxu1 %v60_v3  ;;  %756 = vmatprep.mubr.msk.f32.mxu0 %vm332_vm5, %v324_v36  ;;  %v318_v51 = vld [vmem:[%s1087_s2] sm:$0xff]  ;;  %v325_v52 = vld [vmem:[%s1092_s7 + $0x8] sm:$0xff]  ;;  %v326_v53 = vld [vmem:[%s1092_s7 + $0x10] sm:$0xff] }
  0x22   :  { %724 = vmatprep.subr.mxu1 %v59_v4  ;;  %v327_v54 = vld [vmem:[%s1092_s7 + $0x18] sm:$0xff]  ;;  %v328_v55 = vld [vmem:[%s1092_s7 + $0x20] sm:$0xff]  ;;  %v329_v56 = vld [vmem:[%s1092_s7 + $0x28] sm:$0xff] }
  0x23   :  { %725 = vmatpush3.msra.mxu1 %v59_v4  ;;  %v330_v57 = vld [vmem:[%s1092_s7 + $0x30] sm:$0xff]  ;;  %v331_v62 = vld [vmem:[%s1092_s7 + $0x38] sm:$0xff]  ;;  %v277_v63 = vld [vmem:[%s1086_s1 + $0x8] sm:$0xff]  ;;  %s876_s7 = smov 2  }
  0x24   :  { %727 = vmatmul.mubr.msk.f32.vlgmr.msra.gmra.mxu1 %vm70_vm0, %v58_v5  ;;  %729 = vmatprep.subr.mxu1 %v157_v6  ;;  %v276_v0 = vld [vmem:[%s1086_s1] sm:$0xff]  ;;  %s875_s1 = smov 1  }
  0x25   :  { %730 = vmatpush3.msra.mxu1 %v157_v6  ;;  %v464_v1 = vld [vmem:[%s1093_s8] sm:$0xff] }
  0x26   :  { %731 = vmatprep.subr.mxu1 %v156_v7 }
  0x27   :  { %732 = vmatpush3.msra.mxu1 %v156_v7 }
  0x28   :  { %733 = vmatprep.subr.mxu1 %v155_v8 }
  0x29   :  { %734 = vmatpush3.msra.mxu1 %v155_v8 }
  0x2a   :  { %735 = vmatprep.subr.mxu1 %v154_v9 }
  0x2b   :  { %736 = vmatpush3.msra.mxu1 %v154_v9 }
  0xe4   :  { %v728_v11 = vpop.f32.mrf.mxu1 }
  0xe5   :  { %v149_v12 = vadd.f32 %v728_v11, %v668_v10 }
  0xe6   :  { %v143_v13 = vpop.f32.mrf.mxu1 }
  0xe7   :  { %v144_v14 = vadd.f32 %v668_v10, %v143_v13  ;;  %v153_v16 = vmax.f32 %v149_v12, 0.0  ;;  %v874_v12 = vmov 0.0  }
  0xe9   :  { %v152_v15 = vmax.f32 %v144_v14, 0.0 }
  0xeb   :  { %737 = vmatprep.mubr.msk.f32.mxu1 %vm70_vm0, %v152_v15 }
  0xec   :  { %738 = vmatmul.mubr.msk.f32.vlgmr.msra.gmra.mxu1 %vm70_vm0, %v153_v16  ;;  %vm635_vm0 = vcmask 31744  }
  0xed   :  { %772 = vmatprep.mubr.msk.f32.mxu1 %vm468_vm6, %v464_v1 }
 0x1ac   :  { %v739_v20 = vpop.f32.mrf.mxu1 }
 0x1ad   :  { %v973_v21 = vadd.f32 %v739_v20, %v671_v19 }
 0x1ae   :  { %v237_v22 = vpop.f32.mrf.mxu1 }
 0x1af   :  { %v975_v23 = vadd.f32 %v671_v19, %v237_v22  ;;  %v311_v24 = vsel %vm309_vm1, %v973_v21, 0.0  ;;  %v302_v25 = vsel %vm300_vm2, %v973_v21, 0.0  ;;  %v250_v32 = vsel %vm248_vm4, %v973_v21, -1e+30 }
 0x1b0   :  { %v315_v26 = vsel %vm251_vm3, %v311_v24, 0.0  ;;  %v306_v27 = vsel %vm251_vm3, %v302_v25, 0.0  ;;  %v255_v34 = vsel %vm251_vm3, %v250_v32, -inf }
 0x1b1   :  { %316 = vadd.xlane.f32.xlu0 %v315_v26  ;;  %307 = vadd.xlane.f32.xlu1 %v306_v27  ;;  %v310_v28 = vsel %vm309_vm1, %v975_v23, 0.0  ;;  %v301_v29 = vsel %vm300_vm2, %v975_v23, 0.0  ;;  %v249_v33 = vsel %vm248_vm4, %v975_v23, -1e+30  ;;  %vm650_vm1 = vcmask 0  }
 0x1b2   :  { %v312_v30 = vsel %vm251_vm3, %v310_v28, 0.0  ;;  %v303_v31 = vsel %vm251_vm3, %v301_v29, 0.0  ;;  %v252_v35 = vsel %vm251_vm3, %v249_v33, -inf }
 0x1b5   :  { %313 = vadd.xlane.f32.xlu0 %v312_v30  ;;  %304 = vadd.xlane.f32.xlu1 %v303_v31 }
 0x1b9   :  { %256 = vmax.xlane.f32.xlu1 %v255_v34  ;;  %253 = vmax.xlane.f32.xlu0 %v252_v35 }
 0x23a   :  { %v994_v38 = vpop.xlane.xlu0 %316  ;;  %v996_v39 = vpop.xlane.xlu1 %307 }
 0x23b   :  { %740 = vmatprep.subr.mxu0 %v994_v38 }
 0x23c   :  { %741 = vmatpush3.msra.mxu0 %v994_v38 }
 0x23e   :  { %v1000_v40 = vpop.xlane.xlu0 %313  ;;  %v1002_v41 = vpop.xlane.xlu1 %304 }
 0x23f   :  { %742 = vmatprep.subr.mxu0 %v1000_v40 }
 0x240   :  { %743 = vmatpush3.msra.mxu0 %v1000_v40 }
 0x241   :  { %744 = vmatprep.subr.mxu0 %v996_v39 }
 0x242   :  { %745 = vmatpush3.msra.mxu0 %v996_v39  ;;  %v257_v42 = vpop.xlane.xlu1 %256  ;;  %v254_v43 = vpop.xlane.xlu0 %253 }
 0x243   :  { %v259_v45 = vsub.f32 %v250_v32, %v257_v42  ;;  %v258_v46 = vsub.f32 %v249_v33, %v254_v43  ;;  %746 = vmatprep.subr.mxu0 %v1002_v41 }
 0x244   :  { %747 = vmatpush3.msra.mxu0 %v1002_v41 }
 0x245   :  { %v262_v48 = vmul.f32 1.442695, %v259_v45  ;;  %v260_v49 = vmul.f32 1.442695, %v258_v46  ;;  %748 = vmatprep.subr.mxu0 %v321_v44 }
 0x246   :  { %749 = vmatpush3.msra.mxu0 %v321_v44 }
 0x247   :  { %785 = vpow2.f32 %v262_v48  ;;  %750 = vmatprep.subr.mxu0 %v320_v47 }
 0x248   :  { %787 = vpow2.f32 %v260_v49  ;;  %751 = vmatpush3.msra.mxu0 %v320_v47  ;;  %v323_v47 = vld [vmem:[%s1087_s2 + $0x28] sm:$0xff] }
 0x249   :  { %752 = vmatprep.subr.mxu0 %v319_v50 }
 0x24a   :  { %753 = vmatpush3.msra.mxu0 %v319_v50 }
 0x24b   :  { %754 = vmatprep.subr.mxu0 %v318_v51 }
 0x24c   :  { %755 = vmatpush3.msra.mxu0 %v318_v51 }
 0x24d   :  { %757 = vmatmul.mubr.msk.f32.vlgmr.msra.gmra.mxu0 %vm332_vm5, %v325_v52 }
 0x24e   :  { %759 = vmatprep.mubr.msk.f32.mxu0 %vm332_vm5, %v326_v53 }
 0x251   :  { %760 = vmatmul.mubr.msk.f32.gmra.mxu0 %vm332_vm5, %v327_v54 }
 0x252   :  { %762 = vmatprep.mubr.msk.f32.mxu0 %vm332_vm5, %v328_v55 }
 0x254   :  { %v786_v58 = vpop.eup %785 }
 0x255   :  { %v788_v59 = vpop.eup %787  ;;  %763 = vmatmul.mubr.msk.f32.gmra.mxu0 %vm332_vm5, %v329_v56  ;;  %v267_v60 = vsel %vm251_vm3, %v786_v58, 0.0 }
 0x256   :  { %268 = vadd.xlane.f32.xlu1 %v267_v60  ;;  %v264_v61 = vsel %vm251_vm3, %v788_v59, 0.0  ;;  %765 = vmatprep.mubr.msk.f32.mxu0 %vm332_vm5, %v330_v57 }
 0x257   :  { %265 = vadd.xlane.f32.xlu0 %v264_v61 }
 0x259   :  { %766 = vmatmul.mubr.msk.f32.gmra.mxu0 %vm332_vm5, %v331_v62 }
 0x267   :  { %282 = vperm.xlu1 %784, %v277_v63  }
 0x26d   :  { %279 = vperm.xlu0 %783, %v276_v0  }
 0x2df   :  { %v269_v2 = vpop.xlane.xlu1 %268 }
 0x2e0   :  { %789 = vlog2.f32 %v269_v2  ;;  %v266_v3 = vpop.xlane.xlu0 %265 }
 0x2e1   :  { %791 = vlog2.f32 %v266_v3 }
 0x2e3   :  { %v283_v4 = vpop.permute.xlu1 %282 }
 0x2e4   :  { %vm285_vm7 = vcmp.eq.s32.totalorder %v969_v18, %v283_v4 }
 0x2e5   :  { %v675_v13 = vsel %vm285_vm7, 1.0, %v874_v12 }
 0x2e8   :  { %v280_v5 = vpop.permute.xlu0 %279 }
 0x2e9   :  { %vm284_vm8 = vcmp.eq.s32.totalorder %v969_v18, %v280_v5 }
 0x2ea   :  { %v674_v14 = vsel %vm284_vm8, 1.0, %v874_v12 }
 0x2ed   :  { %v790_v6 = vpop.eup %789 }
 0x2ee   :  { %v792_v7 = vpop.eup %791  ;;  %v273_v8 = vmul.f32 0.6931472, %v790_v6 }
 0x2ef   :  { %v271_v9 = vmul.f32 0.6931472, %v792_v7 }
 0x2f0   :  { %v275_v10 = vadd.f32 %v273_v8, %v257_v42 }
 0x2f1   :  { %v274_v11 = vadd.f32 %v271_v9, %v254_v43 }
 0x2f2   :  { %v291_v15 = vsub.f32 %v973_v21, %v275_v10 }
 0x2f3   :  { %v290_v16 = vsub.f32 %v975_v23, %v274_v11 }
 0x2f4   :  { %v293_v17 = vmul.f32 %v675_v13, %v291_v15 }
 0x2f5   :  { %v292_v19 = vmul.f32 %v674_v14, %v290_v16 }
 0x2f6   :  { %v297_v20 = vsel %vm251_vm3, %v293_v17, 0.0 }
 0x2f7   :  { %298 = vadd.xlane.f32.xlu0 %v297_v20  ;;  %v294_v22 = vsel %vm251_vm3, %v292_v19, 0.0 }
 0x2f8   :  { %295 = vadd.xlane.f32.xlu1 %v294_v22 }
 0x30d   :  { %v758_v24 = vpop.f32.mrf.mxu0 }
 0x30e   :  { %v591_v18 = vsub.f32 %v996_v39, %v758_v24  ;;  %v322_v39 = vld [vmem:[%s1087_s2 + $0x20] sm:$0xff]  ;;  %s878_s2 = smov [#allocation7]  }
 0x30f   :  { %v423_v25 = vpop.f32.mrf.mxu0 }
 0x310   :  { %v593_v26 = vmul.f32 %v591_v18, %v591_v18  ;;  %v590_v27 = vsub.f32 %v1002_v41, %v423_v25 }
 0x311   :  { %v761_v28 = vpop.f32.mrf.mxu0 }
 0x312   :  { %v595_v29 = vmul.f32 0.5, %v593_v26  ;;  %v592_v21 = vmul.f32 %v590_v27, %v590_v27  ;;  %v597_v23 = vsub.f32 %v994_v38, %v761_v28 }
 0x313   :  { %v433_v30 = vpop.f32.mrf.mxu0 }
 0x314   :  { %v599_v31 = vmul.f32 %v597_v23, %v597_v23  ;;  %606 = vrot.lane.b32.xlu1 %v595_v29, %s875_s1  ;;  %v594_v33 = vmul.f32 0.5, %v592_v21  ;;  %v596_v35 = vsub.f32 %v1000_v40, %v433_v30  ;;  %v465_v40 = vld [vmem:[%s1093_s8 + $0x8] sm:$0xff]  ;;  %s658_s8 = sshll.u32 %s878_s2, 4  ;;  %s659_s8 = int_to_ptr.vmem [resolvable:$true] %s658_s8 }
 0x315   :  { %v764_v32 = vpop.f32.mrf.mxu0  ;;  %s845_s25 = scalar_lea.vmem %s659_s8, 16  ;;  %s849_s6 = scalar_lea.vmem %s659_s8, 32 }
 0x316   :  { %v601_v34 = vmul.f32 2.0, %v599_v31  ;;  %v598_v41 = vmul.f32 %v596_v35, %v596_v35  ;;  %p846_p10 = scmp.ne.s32.totalorder %s659_s8, %s845_s25  ;;  %p850_p11 = scmp.lt.s32.totalorder %s659_s8, %s659_s8 }
 0x317   :  { %v443_v36 = vpop.f32.mrf.mxu0  ;;  %p851_p12 = scmp.lt.s32.totalorder %s849_s6, %s845_s25 }
 0x318   :  { %614 = vrot.lane.b32.xlu0 %v601_v34, %s876_s7  ;;  %604 = vrot.lane.b32.xlu1 %v594_v33, %s875_s1  ;;  %v600_v45 = vmul.f32 2.0, %v598_v41 }
 0x319   :  { %v767_v37 = vpop.f32.mrf.mxu0  ;;  %p852_p13 = por %p851_p12, %p850_p11 }
 0x31a   :  { %v463_v38 = vsub.f32 %v764_v32, %v767_v37 }
 0x31b   :  { %v453_v42 = vpop.f32.mrf.mxu0  ;;  %p853_p0 = pnand %p852_p13, %p846_p10 }
 0x31c   :  { %v467_v43 = vmul.f32 %v463_v38, %v463_v38  ;;  %v462_v44 = vsub.f32 %v443_v36, %v453_v42  ;;  %620 = vrot.lane.b32.xlu1 %v322_v39, %s877_s21 }
 0x31e   :  { %v466_v46 = vmul.f32 %v462_v44, %v462_v44  ;;  %768 = vmatprep.subr.mxu1 %v467_v43 }
 0x31f   :  { %769 = vmatpush3.msra.mxu1 %v467_v43 }
 0x320   :  { %770 = vmatprep.subr.mxu1 %v466_v46  ;;  %612 = vrot.lane.b32.xlu1 %v600_v45, %s876_s7 }
 0x321   :  { %771 = vmatpush3.msra.mxu1 %v466_v46 }
 0x322   :  { %773 = vmatmul.mubr.msk.f32.vlgmr.msra.gmra.mxu1 %vm468_vm6, %v465_v40 }
 0x324   :  { %622 = vrot.lane.b32.xlu1 %v323_v47, %s877_s21 }
 0x380   :  { %v299_v52 = vpop.xlane.xlu0 %298 }
 0x381   :  { %v296_v53 = vpop.xlane.xlu1 %295  ;;  %v573_v54 = vsub.f32 %v299_v52, %v299_v52 }
 0x382   :  { %v572_v55 = vsub.f32 %v296_v53, %v296_v53 }
 0x383   :  { %v576_v56 = vmul.f32 1.442695, %v573_v54 }
 0x384   :  { %v574_v58 = vmul.f32 1.442695, %v572_v55 }
 0x386   :  { %v607_v3 = vpop.permute.xlu1 %606 }
 0x38a   :  { %v605_v7 = vpop.permute.xlu1 %604  ;;  %v615_v21 = vpop.permute.xlu0 %614 }
 0x38e   :  { %v621_v11 = vpop.permute.xlu1 %620 }
 0x392   :  { %v613_v20 = vpop.permute.xlu1 %612 }
 0x396   :  { %v623_v28 = vpop.permute.xlu1 %622 }
 0x3e2   :  { %v774_v48 = vpop.f32.mrf.mxu1 }
 0x3e3   :  { %v551_v49 = vmul.f32 1.1428572, %v774_v48 }
 0x3e4   :  { %v541_v50 = vpop.f32.mrf.mxu1 }
 0x3e5   :  { %793 = vrsqrt.f32 %v551_v49  ;;  %v550_v51 = vmul.f32 1.1428572, %v541_v50  ;;  %vm561_vm9 = vcmp.eq.f32.partialorder %v551_v49, inf  ;;  %v564_v60 = vand.u32 2147483648, %v551_v49 }
 0x3e6   :  { %vm563_vm10 = vcmp.eq.f32.partialorder %v551_v49, 0.0 }
 0x3e7   :  { %795 = vrsqrt.f32 %v550_v51  ;;  %vm554_vm11 = vcmp.eq.f32.partialorder %v550_v51, inf  ;;  %v557_v2 = vand.u32 2147483648, %v550_v51  ;;  %vm556_vm12 = vcmp.eq.f32.partialorder %v550_v51, 0.0 }
 0x3e8   :  { %797 = vpow2.f32 %v576_v56 }
 0x3e9   :  { %799 = vpow2.f32 %v574_v58 }
 0x3f2   :  { %v794_v57 = vpop.eup %793 }
 0x3f3   :  { %v560_v59 = vmul.f32 %v794_v57, %v551_v49 }
 0x3f4   :  { %v796_v61 = vpop.eup %795 }
 0x3f5   :  { %v562_v62 = vsel %vm561_vm9, %v551_v49, %v560_v59  ;;  %v553_v0 = vmul.f32 %v796_v61, %v550_v51  ;;  %v798_v8 = vpop.eup %797 }
 0x3f6   :  { %v565_v63 = vsel %vm563_vm10, %v564_v60, %v562_v62  ;;  %v800_v9 = vpop.eup %799  ;;  %v581_v10 = vmax.f32 %v798_v8, 0.8 }
 0x3f7   :  { %v567_v1 = vadd.f32 1.1920929e-07, %v565_v63  ;;  %v555_v4 = vsel %vm554_vm11, %v550_v51, %v553_v0  ;;  %v580_v13 = vmax.f32 %v800_v9, 0.8 }
 0x3f8   :  { %v558_v5 = vsel %vm556_vm12, %v557_v2, %v555_v4  ;;  %v583_v15 = vmin.f32 %v581_v10, 1.2 }
 0x3f9   :  { %801 = vrcp.f32 %v567_v1  ;;  %v566_v6 = vadd.f32 1.1920929e-07, %v558_v5  ;;  %v582_v24 = vmin.f32 %v580_v13, 1.2 }
 0x3fb   :  { %803 = vrcp.f32 %v566_v6 }
 0x406   :  { %v802_v12 = vpop.eup %801 }
 0x407   :  { %v571_v14 = vmul.f32 %v802_v12, %v463_v38 }
 0x408   :  { %v804_v16 = vpop.eup %803 }
 0x409   :  { %v579_v17 = vmul.f32 %v798_v8, %v571_v14  ;;  %v585_v19 = vmul.f32 %v583_v15, %v571_v14  ;;  %v569_v22 = vmul.f32 %v804_v16, %v462_v44 }
 0x40b   :  { %v587_v18 = vmin.f32 %v579_v17, %v585_v19  ;;  %v578_v25 = vmul.f32 %v800_v9, %v569_v22  ;;  %v584_v26 = vmul.f32 %v582_v24, %v569_v22 }
 0x40d   :  { %v589_v27 = vsub.f32 0.0, %v587_v18  ;;  %v586_v29 = vmin.f32 %v578_v25, %v584_v26 }
 0x40f   :  { %v628_v23 = vsel %vm626_vm13, %v589_v27, %v607_v3  ;;  %v588_v31 = vsub.f32 0.0, %v586_v29 }
 0x410   :  { %v631_v30 = vsel %vm629_vm14, %v628_v23, %v615_v21 }
 0x411   :  { %v634_v32 = vsel %vm632_vm15, %v631_v30, %v623_v28  ;;  %v627_v34 = vsel %vm626_vm13, %v588_v31, %v605_v7 }
 0x412   :  { %v639_v33 = vsel %vm635_vm0, %v634_v32, 0.0  ;;  %v630_v35 = vsel %vm629_vm14, %v627_v34, %v613_v20 }
 0x413   :  { %640 = vadd.xlane.f32.xlu0 %v639_v33  ;;  %v633_v36 = vsel %vm632_vm15, %v630_v35, %v621_v11 }
 0x414   :  { %v636_v37 = vsel %vm635_vm0, %v633_v36, 0.0 }
 0x415   :  { %637 = vadd.xlane.f32.xlu1 %v636_v37 }
 0x49c   :  { %v641_v39 = vpop.xlane.xlu0 %640 }
 0x49e   :  { %v638_v41 = vpop.xlane.xlu1 %637 }
 0x49f   :  { %v642_v38 = vadd.f32 %v641_v39, %v638_v41 }
 0x4a1   :  { %v643_v42 = vrot.slane %v642_v38, 4 }
 0x4a3   :  { %v644_v43 = vadd.f32 %v643_v42, %v642_v38 }
 0x4a5   :  { %v645_v44 = vrot.slane %v644_v43, 2 }
 0x4a7   :  { %v646_v45 = vadd.f32 %v645_v44, %v644_v43 }
 0x4a9   :  { %v647_v46 = vrot.slane %v646_v45, 1 }
 0x4ab   :  { %v648_v40 = vadd.f32 %v647_v46, %v646_v45 }
 0x4ad   :  { %v649_v47 = vmul.f32 0.03125, %v648_v40 }
 0x4af   :  { %651 = vst.msk [vmem:[#allocation7] sm:$0x1] %vm650_vm1, %v649_v47 }
 0x4b0   :  { %856 = shalt.err (!%p853_p0)
}
 0x4b1   :  { %661 = dma.vmem_to_hbm [thread:$0]  %s659_s8, 16, %s1094_s9, [#allocation4]  }
 0x4b2   :  { %869 = dma.done.wait [#allocation4], 16  }
 0x4b3   :  { %870 = vsyncadd [#allocation4], 4294967280 }
 0x4b4   :  { %665 = vsyncpa [#allocation3], 1 }
 0x4b5   :  { %666 = vsyncpa [#allocation6], 1 }
 0x4b6   :  { %667 = vsyncpa [#allocation4], 1 }

</bundles_post_ra>
